<compile_context>
chip_gen: v5e
topology: v5e:2x2
jax: 0.10.0
libtpu: 0.0.40
codegen_flags: <defaults>
</compile_context>

<pallas_src>
import functools

import jax
import jax.numpy as jnp
from jax.experimental import pallas as pl
from jax.experimental.pallas import tpu as pltpu

_LANE = 128
_MIB = 1024 * 1024


def _round_up(x, m):
    return (x + m - 1) // m * m


def _pad2d(a, rows, cols, dtype):
    """Zero-pad a 2-D array to (rows, cols) and cast; no-op if already padded."""
    if a.shape == (rows, cols) and a.dtype == jnp.dtype(dtype):
        return a
    out = jnp.zeros((rows, cols), dtype)
    return out.at[: a.shape[0], : a.shape[1]].set(a.astype(dtype))


def _softmax_masked(out, valid_out):
    # Mask zero-padded output lanes so they do not pollute the softmax.
    lane = jax.lax.broadcasted_iota(jnp.int32, out.shape, 1)
    out = jnp.where(lane < valid_out, out, -jnp.inf)
    m = jnp.max(out, axis=-1, keepdims=True)
    e = jnp.exp(out - m)
    return e / jnp.sum(e, axis=-1, keepdims=True)  # exact division: rows sum to 1


def _mlp_kernel_resident(x_ref, w1_ref, b1_ref, w2_ref, b2_ref, o_ref, *,
                         apply_softmax, valid_out):
    # fc1 + ReLU (f32 accumulation on the MXU).
    h = jnp.dot(x_ref[...], w1_ref[...], preferred_element_type=jnp.float32)
    h = jnp.maximum(h + b1_ref[...], 0.0)                 # b1 is (1, hid_p)
    # fc2
    out = jnp.dot(h.astype(w2_ref.dtype), w2_ref[...],
                  preferred_element_type=jnp.float32)
    out = out + b2_ref[...]                               # b2 is (1, out_p)
    if apply_softmax:
        out = _softmax_masked(out, valid_out)
    o_ref[...] = out.astype(o_ref.dtype)


def _mlp_kernel_stream(x_ref, w1_ref, b1_ref, w2_ref, b2_ref, o_ref, acc_ref, *,
                       apply_softmax, valid_out):
    # Hidden-dim streaming fallback: grid = (batch tiles, hidden tiles).
    k = pl.program_id(1)

    @pl.when(k == 0)
    def _():
        acc_ref[...] = jnp.zeros_like(acc_ref)

    h = jnp.dot(x_ref[...], w1_ref[...], preferred_element_type=jnp.float32)
    h = jnp.maximum(h + b1_ref[...], 0.0)                 # ReLU is elementwise per chunk
    acc_ref[...] += jnp.dot(h.astype(w2_ref.dtype), w2_ref[...],
                            preferred_element_type=jnp.float32)

    @pl.when(k == pl.num_programs(1) - 1)
    def _():
        out = acc_ref[...] + b2_ref[...]
        if apply_softmax:
            out = _softmax_masked(out, valid_out)
        o_ref[...] = out.astype(o_ref.dtype)


def _vmem_budget():
    try:
        cap = int(pltpu.get_tpu_info().vmem_capacity_bytes)
    except Exception:
        cap = 64 * _MIB  # conservative fallback (v7x per-TensorCore VMEM)
    # Leave compiler scratch / spill headroom: ~51 MiB on v7x, ~102 MiB on v5e/v6e.
    budget = min(int(cap * 0.8), cap - 8 * _MIB)
    return cap, budget


def mlp_forward(x, w1, b1, w2, b2, apply_softmax=False,
                compute_dtype=jnp.bfloat16, force_stream=False, hidden_tile=None):
    """Pallas equivalent of MultiLayerPerceptron.forward.

    x:  (batch, input_dim)
    w1: (input_dim, hidden_dim),  b1: (hidden_dim,)   [nn.Linear weight transposed]
    w2: (hidden_dim, output_dim), b2: (output_dim,)
    returns (batch, output_dim) in x.dtype
    """
    batch, input_dim = x.shape
    hidden_dim = w1.shape[1]
    output_dim = w2.shape[1]

    # Lane-dense padded feature dims.
    in_p = _round_up(input_dim, _LANE)
    hid_p = _round_up(hidden_dim, _LANE)
    out_p = _round_up(output_dim, _LANE)

    compute_dtype = jnp.dtype(compute_dtype)
    xb = wb = compute_dtype.itemsize            # bf16: 2 bytes, f32: 4 bytes
    ob = jnp.dtype(x.dtype).itemsize
    row_align = 16 if xb < 4 else 8             # bf16 packs 2 rows/sublane

    cap, budget = _vmem_budget()

    # Working sets INCLUDE Pallas' default double-buffering of every input/output
    # BlockSpec (even the constant-index_map weight specs) plus compute intermediates.
    def ws_resident(tm_):
        return (2 * tm_ * in_p * xb
                + 2 * (in_p * hid_p + hid_p * out_p) * wb
                + 2 * (hid_p + out_p) * 4
                + 2 * tm_ * out_p * ob
                + tm_ * (hid_p * 4 + hid_p * wb + out_p * 4))

    def ws_stream(tm_, th_):
        return (2 * tm_ * in_p * xb
                + 2 * (in_p * th_ + th_ * out_p) * wb
                + 2 * (th_ + out_p) * 4
                + 2 * tm_ * out_p * ob
                + tm_ * out_p * 4                              # accumulator scratch
                + tm_ * (th_ * 4 + th_ * wb + out_p * 4))

    def fit_tm(fits):
        tm_ = max(row_align, min(512, _round_up(batch, row_align)))
        while tm_ > row_align and not fits(tm_):
            tm_ = max(row_align, (tm_ // 2) // row_align * row_align)
        return tm_

    use_stream = bool(force_stream)
    tm = fit_tm(lambda t: ws_resident(t) <= budget)
    if not use_stream and ws_resident(tm) > budget:
        # Resident weights alone exceed the budget (v7x large-model case) -> stream.
        use_stream = True

    th = None
    if use_stream:
        if hidden_tile is not None:
            th = int(hidden_tile)
        else:
            th = 128
            for c in (1024, 512, 256, 128):
                if hid_p % c == 0 and ws_stream(row_align, c) <= budget:
                    th = c
                    break
        tm = fit_tm(lambda t: ws_stream(t, th) <= budget)
        ws = ws_stream(tm, th)
    else:
        ws = ws_resident(tm)

    # Prefer >= 2 batch tiles so both v7x TensorCores get work (free on v5e/v6e).
    batch_p = _round_up(batch, tm)
    if batch_p // tm < 2:
        cand = _round_up((batch + 1) // 2, row_align)
        if row_align <= cand < tm:
            tm = cand
            batch_p = _round_up(batch, tm)

    # Pad / cast operands (skipped when already padded).  Padding contributes exactly 0
    # to real outputs; padded softmax lanes are masked inside the kernel.
    # TODO(synk): hoist weight/bias padding + bf16 casting to parameter-setup time so it
    # is not re-done (and re-written to HBM) on every forward call.
    f32 = jnp.float32
    x_p = _pad2d(x, batch_p, in_p, compute_dtype)
    w1_p = _pad2d(w1, in_p, hid_p, compute_dtype)
    b1_p = _pad2d(b1.reshape(1, -1), 1, hid_p, f32)
    w2_p = _pad2d(w2, hid_p, out_p, compute_dtype)
    b2_p = _pad2d(b2.reshape(1, -1), 1, out_p, f32)

    cost = pl.CostEstimate(
        flops=2 * batch_p * (in_p * hid_p + hid_p * out_p),
        transcendentals=batch_p * out_p if apply_softmax else 0,
        bytes_accessed=(xb * batch_p * in_p
                        + wb * (in_p * hid_p + hid_p * out_p)
                        + 4 * (hid_p + out_p)
                        + ob * batch_p * out_p),
    )
    vmem_limit = int(min(cap - 4 * _MIB, max(32 * _MIB, ws + 8 * _MIB)))

    if not use_stream:
        kernel = functools.partial(_mlp_kernel_resident,
                                   apply_softmax=apply_softmax, valid_out=output_dim)
        grid_spec = pltpu.PrefetchScalarGridSpec(
            num_scalar_prefetch=0,
            grid=(batch_p // tm,),
            in_specs=[
                pl.BlockSpec((tm, in_p), lambda i: (i, 0)),      # x: tiled over batch
                pl.BlockSpec((in_p, hid_p), lambda i: (0, 0)),   # w1: VMEM-resident
                pl.BlockSpec((1, hid_p), lambda i: (0, 0)),      # b1: VMEM-resident
                pl.BlockSpec((hid_p, out_p), lambda i: (0, 0)),  # w2: VMEM-resident
                pl.BlockSpec((1, out_p), lambda i: (0, 0)),      # b2: VMEM-resident
            ],
            out_specs=pl.BlockSpec((tm, out_p), lambda i: (i, 0)),
        )
        dim_sem = ("parallel",)
    else:
        kernel = functools.partial(_mlp_kernel_stream,
                                   apply_softmax=apply_softmax, valid_out=output_dim)
        grid_spec = pltpu.PrefetchScalarGridSpec(
            num_scalar_prefetch=0,
            grid=(batch_p // tm, hid_p // th),
            in_specs=[
                pl.BlockSpec((tm, in_p), lambda i, k: (i, 0)),   # x tile (resident over k)
                pl.BlockSpec((in_p, th), lambda i, k: (0, k)),   # w1 hidden chunk
                pl.BlockSpec((1, th), lambda i, k: (0, k)),      # b1 hidden chunk
                pl.BlockSpec((th, out_p), lambda i, k: (k, 0)),  # w2 hidden chunk
                pl.BlockSpec((1, out_p), lambda i, k: (0, 0)),   # b2
            ],
            out_specs=pl.BlockSpec((tm, out_p), lambda i, k: (i, 0)),
            scratch_shapes=[pltpu.VMEM((tm, out_p), jnp.float32)],
        )
        dim_sem = ("parallel", "arbitrary")

    out_padded = pl.pallas_call(
        kernel,
        out_shape=jax.ShapeDtypeStruct((batch_p, out_p), x.dtype),
        grid_spec=grid_spec,
        compiler_params=pltpu.CompilerParams(
            dimension_semantics=dim_sem,
            vmem_limit_bytes=vmem_limit,
        ),
        cost_estimate=cost,
    )(x_p, w1_p, b1_p, w2_p, b2_p)

    # Strip batch / lane padding.
    return out_padded[:batch, :output_dim]


def _ref_forward(x, w1, b1, w2, b2, apply_softmax=False):
    h = jnp.maximum(x @ w1 + b1, 0.0)
    out = h @ w2 + b2
    if apply_softmax:
        out = jax.nn.softmax(out, axis=1)
    return out


if __name__ == "__main__":
    # Deterministic synthetic parameters (shapes per nn.Linear in __init__).
    batch, input_dim, hidden_dim, output_dim = 8, 16, 32, 10
    key = jax.random.PRNGKey(0)
    kx, kw1, kb1, kw2, kb2 = jax.random.split(key, 5)

    x = jax.random.normal(kx, (batch, input_dim), dtype=jnp.float32)
    # nn.Linear stores weight as (out, in); we keep the (in, out) transpose for x @ W.
    w1 = jax.random.normal(kw1, (input_dim, hidden_dim), dtype=jnp.float32) * 0.1
    b1 = jax.random.normal(kb1, (hidden_dim,), dtype=jnp.float32) * 0.1
    w2 = jax.random.normal(kw2, (hidden_dim, output_dim), dtype=jnp.float32) * 0.1
    b2 = jax.random.normal(kb2, (output_dim,), dtype=jnp.float32) * 0.1

    ref = _ref_forward(x, w1, b1, w2, b2, apply_softmax=False)
    ref_sm = _ref_forward(x, w1, b1, w2, b2, apply_softmax=True)

    # 1) Default path: bf16 operands, f32 accumulation, resident weights.
    out = jax.block_until_ready(mlp_forward(x, w1, b1, w2, b2, apply_softmax=False))
    assert out.shape == (batch, output_dim)
    assert jnp.allclose(out, ref, atol=3e-2, rtol=3e-2)

    # 2) Softmax path (exact division -> rows sum to 1).
    out_sm = jax.block_until_ready(mlp_forward(x, w1, b1, w2, b2, apply_softmax=True))
    assert out_sm.shape == (batch, output_dim)
    assert jnp.allclose(out_sm, ref_sm, atol=2e-2, rtol=2e-2)
    assert jnp.allclose(jnp.sum(out_sm, axis=1), jnp.ones((batch,)), atol=1e-3)

    # 3) f32 operand path: tight tolerance against the reference.
    out_f32 = jax.block_until_ready(
        mlp_forward(x, w1, b1, w2, b2, apply_softmax=False,
                    compute_dtype=jnp.float32))
    assert jnp.allclose(out_f32, ref, atol=1e-5, rtol=1e-5)

    # 4) Hidden-dim streaming fallback (forced, 2 hidden tiles of 128).
    hd2 = 256
    w1b = jax.random.normal(kw1, (input_dim, hd2), dtype=jnp.float32) * 0.1
    b1b = jax.random.normal(kb1, (hd2,), dtype=jnp.float32) * 0.1
    w2b = jax.random.normal(kw2, (hd2, output_dim), dtype=jnp.float32) * 0.1
    ref_b = _ref_forward(x, w1b, b1b, w2b, b2, apply_softmax=False)
    out_b = jax.block_until_ready(
        mlp_forward(x, w1b, b1b, w2b, b2, apply_softmax=False,
                    compute_dtype=jnp.float32, force_stream=True, hidden_tile=128))
    assert jnp.allclose(out_b, ref_b, atol=1e-4, rtol=1e-4)

    print("KERNEL_OK")
</pallas_src>

<mosaic_0001>
module attributes {stable_mosaic.version = 11 : i64} {
  func.func @_mlp_kernel_resident(%arg0: i32, %arg1: memref<16x128xbf16, #tpu.memory_space<vmem>>, %arg2: memref<128x128xbf16, #tpu.memory_space<vmem>>, %arg3: memref<1x128xf32, #tpu.memory_space<vmem>>, %arg4: memref<128x128xbf16, #tpu.memory_space<vmem>>, %arg5: memref<1x128xf32, #tpu.memory_space<vmem>>, %arg6: memref<16x128xf32, #tpu.memory_space<vmem>>) attributes {dimension_semantics = [#tpu.dimension_semantics<parallel>], iteration_bounds = array<i64: 1>, scalar_prefetch = 0 : i64, scratch_operands = 0 : i64, tpu.core_type = #tpu.core_type<tc>, window_params = [{transform_indices = @transform_0, window_bounds = array<i64: 16, 128>}, {pipeline_mode = #tpu.pipeline_mode<synchronous>, transform_indices = @transform_1, window_bounds = array<i64: 128, 128>}, {pipeline_mode = #tpu.pipeline_mode<synchronous>, transform_indices = @transform_2, window_bounds = array<i64: 1, 128>}, {pipeline_mode = #tpu.pipeline_mode<synchronous>, transform_indices = @transform_3, window_bounds = array<i64: 128, 128>}, {pipeline_mode = #tpu.pipeline_mode<synchronous>, transform_indices = @transform_4, window_bounds = array<i64: 1, 128>}, {transform_indices = @transform_5, window_bounds = array<i64: 16, 128>}]} {
    %c0 = arith.constant 0 : index
    %c0_0 = arith.constant 0 : index
    %0 = vector.load %arg1[%c0, %c0_0] : memref<16x128xbf16, #tpu.memory_space<vmem>>, vector<16x128xbf16>
    %c0_1 = arith.constant 0 : index
    %c0_2 = arith.constant 0 : index
    %1 = vector.load %arg2[%c0_1, %c0_2] : memref<128x128xbf16, #tpu.memory_space<vmem>>, vector<128x128xbf16>
    %cst = arith.constant dense<0.000000e+00> : vector<16x128xf32>
    %2 = tpu.matmul %0, %1, %cst {dimension_numbers = #tpu.dot_dimension_numbers<[1], [0], [0], [1], [0, 0, 1, 1], [], []>} : vector<16x128xbf16>, vector<128x128xbf16>, vector<16x128xf32> -> vector<16x128xf32>
    %c0_3 = arith.constant 0 : index
    %c0_4 = arith.constant 0 : index
    %3 = vector.load %arg3[%c0_3, %c0_4] : memref<1x128xf32, #tpu.memory_space<vmem>>, vector<1x128xf32>
    %4 = vector.broadcast %3 : vector<1x128xf32> to vector<16x128xf32>
    %5 = arith.addf %2, %4 : vector<16x128xf32>
    %cst_5 = arith.constant 0.000000e+00 : f32
    %6 = vector.broadcast %cst_5 : f32 to vector<16x128xf32>
    %7 = arith.maximumf %5, %6 : vector<16x128xf32>
    %8 = arith.truncf %7 : vector<16x128xf32> to vector<16x128xbf16>
    %c0_6 = arith.constant 0 : index
    %c0_7 = arith.constant 0 : index
    %9 = vector.load %arg4[%c0_6, %c0_7] : memref<128x128xbf16, #tpu.memory_space<vmem>>, vector<128x128xbf16>
    %cst_8 = arith.constant dense<0.000000e+00> : vector<16x128xf32>
    %10 = tpu.matmul %8, %9, %cst_8 {dimension_numbers = #tpu.dot_dimension_numbers<[1], [0], [0], [1], [0, 0, 1, 1], [], []>} : vector<16x128xbf16>, vector<128x128xbf16>, vector<16x128xf32> -> vector<16x128xf32>
    %c0_9 = arith.constant 0 : index
    %c0_10 = arith.constant 0 : index
    %11 = vector.load %arg5[%c0_9, %c0_10] : memref<1x128xf32, #tpu.memory_space<vmem>>, vector<1x128xf32>
    %12 = vector.broadcast %11 : vector<1x128xf32> to vector<16x128xf32>
    %13 = arith.addf %10, %12 : vector<16x128xf32>
    %c0_11 = arith.constant 0 : index
    %c0_12 = arith.constant 0 : index
    %14 = vector.load %arg6[%c0_11, %c0_12] : memref<16x128xf32, #tpu.memory_space<vmem>>, vector<16x128xf32>
    tpu.vector_store %arg6[%c0_11, %c0_12], %13 {strides = array<i32>} : memref<16x128xf32, #tpu.memory_space<vmem>>, vector<16x128xf32>,
    return
  }
  func.func @transform_0(%arg0: i32) -> (i32, i32) {
    %c0_i32 = arith.constant 0 : i32
    %c0_i32_0 = arith.constant 0 : i32
    return %arg0, %c0_i32 : i32, i32
  }
  func.func @transform_1(%arg0: i32) -> (i32, i32) {
    %c0_i32 = arith.constant 0 : i32
    %c0_i32_0 = arith.constant 0 : i32
    %c0_i32_1 = arith.constant 0 : i32
    return %c0_i32, %c0_i32_0 : i32, i32
  }
  func.func @transform_2(%arg0: i32) -> (i32, i32) {
    %c0_i32 = arith.constant 0 : i32
    %c0_i32_0 = arith.constant 0 : i32
    %c0_i32_1 = arith.constant 0 : i32
    return %c0_i32, %c0_i32_0 : i32, i32
  }
  func.func @transform_3(%arg0: i32) -> (i32, i32) {
    %c0_i32 = arith.constant 0 : i32
    %c0_i32_0 = arith.constant 0 : i32
    %c0_i32_1 = arith.constant 0 : i32
    return %c0_i32, %c0_i32_0 : i32, i32
  }
  func.func @transform_4(%arg0: i32) -> (i32, i32) {
    %c0_i32 = arith.constant 0 : i32
    %c0_i32_0 = arith.constant 0 : i32
    %c0_i32_1 = arith.constant 0 : i32
    return %c0_i32, %c0_i32_0 : i32, i32
  }
  func.func @transform_5(%arg0: i32) -> (i32, i32) {
    %c0_i32 = arith.constant 0 : i32
    %c0_i32_0 = arith.constant 0 : i32
    return %arg0, %c0_i32 : i32, i32
  }
}

</mosaic_0001>

<bundles_post_ra>
// kernel: tpu_custom_call.1
= control target key start
LH: loop header
LB: loop body
LE: loop exit
PB: predicated region body
PF: predicated region fallthrough
CT: control target
= control target key end

     0   :  { %10 = vsyncpa [#allocation3], 0  ;;  %s518_s0 = inlined_call_operand.hbm [shape: bf16[16,128], index: 0, kind: input, shape index: {}]   ;;  %s519_s1 = inlined_call_operand.hbm [shape: bf16[128,128], index: 1, kind: input, shape index: {}]   ;;  %s520_s2 = inlined_call_operand.vmem [shape: f32[1,128], index: 2, kind: input, shape index: {}]   ;;  %s521_s3 = inlined_call_operand.hbm [shape: bf16[128,128], index: 3, kind: input, shape index: {}]   ;;  %s522_s4 = inlined_call_operand.vmem [shape: f32[1,128], index: 4, kind: input, shape index: {}]   ;;  %s523_s5 = inlined_call_operand.hbm [shape: f32[16,128], index: 5, kind: output, shape index: {}]  }
   0x1   :  { %11 = vsyncpa [#allocation6], 0 }
   0x2   :  { %12 = vsyncpa [#allocation4], 0  ;;  %s30_s20 = sshll.u32 %s519_s1, 4  ;;  %s462_s21 = smov [#allocation5]   ;;  %s31_s20 = int_to_ptr.hbm [resolvable:$true] %s30_s20 }
   0x3   :  { %s32_s22 = sshll.u32 %s462_s21, 4  ;;  %s17_s25 = sshll.u32 %s518_s0, 4  ;;  %s33_s22 = int_to_ptr.vmem [resolvable:$true] %s32_s22  ;;  %s18_s25 = int_to_ptr.hbm [resolvable:$true] %s17_s25 }
   0x4   :  { %s463_s26 = smov 64   ;;  %s464_s27 = smov 4  }
   0x5   :  { %38 = dma.hbm_to_vmem [thread:$0]  %s31_s20, 1024, %s33_s22, [#allocation6], %s463_s26, %s463_s26, %s464_s27  }
   0x6   :  { %s465_s28 = smov [#allocation2]   ;;  %s45_s7 = sshll.u32 %s521_s3, 4  ;;  %s46_s7 = int_to_ptr.hbm [resolvable:$true] %s45_s7 }
   0x7   :  { %s19_s29 = sshll.u32 %s465_s28, 4  ;;  %s466_s1 = smov [#allocation7]   ;;  %s20_s29 = int_to_ptr.vmem [resolvable:$true] %s19_s29 }
   0x8   :  { %25 = dma.hbm_to_vmem [thread:$0]  %s18_s25, 128, %s20_s29, [#allocation3], %s463_s26, %s463_s26, %s464_s27  }
   0x9   :  { %s47_s8 = sshll.u32 %s466_s1, 4  ;;  %s48_s8 = int_to_ptr.vmem [resolvable:$true] %s47_s8 }
   0xa   :  { %53 = dma.hbm_to_vmem [thread:$0]  %s46_s7, 1024, %s48_s8, [#allocation6], %s463_s26, %s463_s26, %s464_s27  }
   0xb   :  { %456 = dma.done.wait [#allocation3], 128  }
   0xc   :  { %457 = vsyncadd [#allocation3], 4294967168 }
   0xd   :  { %458 = dma.done.wait [#allocation6], 2048  }
   0xe   :  { %459 = vsyncadd [#allocation6], 4294965248  ;;  %v341_v0 = vld [vmem:[#allocation5 + $0x38] sm:$0xff]  ;;  %v340_v1 = vld [vmem:[#allocation5 + $0x30] sm:$0xff]  ;;  %s467_s11 = smov [#allocation8]   ;;  %s468_s15 = smov 128  }
   0xf   :  { %144 = vmatpush.bf16.msra.mxu0 %v341_v0  ;;  %v349_v2 = vld [vmem:[#allocation7 + $0x38] sm:$0xff]  ;;  %v348_v3 = vld [vmem:[#allocation7 + $0x30] sm:$0xff]  ;;  %v339_v4 = vld [vmem:[#allocation5 + $0x28] sm:$0xff]  ;;  %s249_s12 = sshll.u32 %s467_s11, 4  ;;  %s469_s16 = smov 8   ;;  %s250_s12 = int_to_ptr.vmem [resolvable:$true] %s249_s12 }
  0x10   :  { %229 = vmatpush.bf16.msra.mxu1 %v349_v2  ;;  %v347_v5 = vld [vmem:[#allocation7 + $0x28] sm:$0xff]  ;;  %v338_v6 = vld [vmem:[#allocation5 + $0x20] sm:$0xff]  ;;  %v337_v8 = vld [vmem:[#allocation5 + $0x18] sm:$0xff] }
  0x11   :  { %v346_v7 = vld [vmem:[#allocation7 + $0x20] sm:$0xff]  ;;  %v336_v9 = vld [vmem:[#allocation5 + $0x10] sm:$0xff]  ;;  %v335_v10 = vld [vmem:[#allocation5 + $0x8] sm:$0xff] }
  0x12   :  { %v334_v11 = vld [vmem:[#allocation5] sm:$0xff]  ;;  %v333_v12 = vld [vmem:[#allocation2] sm:$0xff]  ;;  %v344_v14 = vld [vmem:[#allocation7 + $0x10] sm:$0xff] }
  0x13   :  { %145 = vmatpush.bf16.msra.mxu0 %v340_v1  ;;  %v345_v13 = vld [vmem:[#allocation7 + $0x18] sm:$0xff]  ;;  %v343_v15 = vld [vmem:[#allocation7 + $0x8] sm:$0xff]  ;;  %v342_v16 = vld [vmem:[#allocation7] sm:$0xff] }
  0x14   :  { %230 = vmatpush.bf16.msra.mxu1 %v348_v3  ;;  %v358_v18 = vld [vmem:[%s520_s2] ss:$0 sm:$0xff]  ;;  %s251_s2 = sshll.u32 %s523_s5, 4  ;;  %s252_s2 = int_to_ptr.hbm [resolvable:$true] %s251_s2 }
  0x15   :  { %v359_v25 = vld [vmem:[%s522_s4] ss:$0 sm:$0xff] }
  0x17   :  { %146 = vmatpush.bf16.msra.mxu0 %v339_v4 }
  0x18   :  { %231 = vmatpush.bf16.msra.mxu1 %v347_v5 }
  0x1b   :  { %147 = vmatpush.bf16.msra.mxu0 %v338_v6 }
  0x1c   :  { %232 = vmatpush.bf16.msra.mxu1 %v346_v7 }
  0x1f   :  { %148 = vmatpush.bf16.msra.mxu0 %v337_v8 }
  0x20   :  { %233 = vmatpush.bf16.msra.mxu1 %v345_v13 }
  0x23   :  { %149 = vmatpush.bf16.msra.mxu0 %v336_v9 }
  0x24   :  { %234 = vmatpush.bf16.msra.mxu1 %v344_v14 }
  0x27   :  { %150 = vmatpush.bf16.msra.mxu0 %v335_v10 }
  0x28   :  { %235 = vmatpush.bf16.msra.mxu1 %v343_v15 }
  0x2b   :  { %151 = vmatpush.bf16.msra.mxu0 %v334_v11 }
  0x2c   :  { %236 = vmatpush.bf16.msra.mxu1 %v342_v16 }
  0x2e   :  { %152 = vmatmul.bf16.vlgmr.msra.gmra.mxu0 %v333_v12 }
  0xab   :  { %v153_v17 = vpop.f32.mrf.mxu0 }
  0xac   :  { %v154_v19 = vadd.f32 %v358_v18, %v153_v17 }
  0xae   :  { %v158_v22 = vmax.f32 %v154_v19, 0.0 }
  0xb3   :  { %v155_v20 = vpop.f32.mrf.mxu0 }
  0xb4   :  { %v156_v21 = vadd.f32 %v358_v18, %v155_v20 }
  0xb6   :  { %v159_v23 = vmax.f32 %v156_v21, 0.0 }
  0xb8   :  { %v160_v24 = vpack.c.bf16 %v159_v23, %v158_v22 }
  0xba   :  { %237 = vmatmul.bf16.vlgmr.msra.gmra.mxu1 %v160_v24 }
 0x137   :  { %v238_v26 = vpop.f32.mrf.mxu1 }
 0x138   :  { %v239_v27 = vadd.f32 %v359_v25, %v238_v26 }
 0x13a   :  { %243 = vst [vmem:[#allocation8] sm:$0xff] %v239_v27 }
 0x13f   :  { %v240_v28 = vpop.f32.mrf.mxu1 }
 0x140   :  { %v241_v29 = vadd.f32 %v359_v25, %v240_v28 }
 0x142   :  { %244 = vst [vmem:[#allocation8 + $0x8] sm:$0xff] %v241_v29 }
 0x143   :  { %257 = dma.vmem_to_hbm [thread:$0]  %s250_s12, 256, %s252_s2, [#allocation4], %s468_s15, %s468_s15, %s469_s16  }
 0x144   :  { %460 = dma.done.wait [#allocation4], 256  }
 0x145   :  { %461 = vsyncadd [#allocation4], 4294967040 }
 0x146   :  { %262 = vsyncpa [#allocation3], 1 }
 0x147   :  { %263 = vsyncpa [#allocation6], 1 }
 0x148   :  { %264 = vsyncpa [#allocation4], 1 }

</bundles_post_ra>
